<compile_context>
chip_gen: v7x
topology: tpu7x:2x2x1
jax: 0.10.0
libtpu: 0.0.40
codegen_flags: <defaults>
</compile_context>

<pallas_src>
import functools

import jax
import jax.numpy as jnp
import numpy as np
from jax import lax
from jax.experimental import pallas as pl
from jax.experimental.pallas import tpu as pltpu


# ---------------------------------------------------------------------------
# Kernel 1: projection.  Row-stacked streams [feat; feat_a] (2N, F_in) hit ONE
# packed weight [w1 | wr] (F_in, 2F_out) -> a single lane-dense (tm, 2F_out)
# slab per step.  (No zero-padded block-diagonal weights.)
# ---------------------------------------------------------------------------
def project_kernel(x_ref, w_ref, b_ref, o_ref):
    # x: (tm, F_in) f32, w: (F_in, 2F_out) f32, b: (1, 2F_out) = [0 | br]
    o_ref[...] = jnp.dot(x_ref[...], w_ref[...],
                         preferred_element_type=jnp.float32) + b_ref[...]


# ---------------------------------------------------------------------------
# Kernel 2: GCN propagation for BOTH streams in one wide MXU pass.
#   zb = adj_rows(bf16) @ [feat@w1 | feat_a@w1](bf16)  + [res | res_a]
# f32 accumulation; zb rows are a single lane-dense store.
# ---------------------------------------------------------------------------
def gcn_kernel(adj_ref, pg_ref, rz_ref, zb_ref):
    zb_ref[...] = jnp.dot(adj_ref[...], pg_ref[...],
                          preferred_element_type=jnp.float32) + rz_ref[...]


# ---------------------------------------------------------------------------
# Kernel 3: second adjacency pass (h = (adj@z)@w2), AvgReadout + sigmoid for
# both streams in one mask pass, and the bilinear discriminator.  Writes ONE
# lane-dense slab [h | ret | ret_a] per row block.
# ---------------------------------------------------------------------------
def head_kernel(adj_ref, mask_ref, zb_ref, z0_ref, eo_ref,
                w2_ref, wd_ref, bd_ref, slab_ref, *, f_out):
    f32 = jnp.float32

    # ---- h = (adj @ z) @ w2   (reassociated: N^2*F_out + N*F_out*F_in) -----
    th = jnp.dot(adj_ref[...], z0_ref[...], preferred_element_type=f32)   # (tm, F)
    h = jnp.dot(th, w2_ref[...], preferred_element_type=f32)              # (tm, F_in)

    # ---- AvgReadout, both streams in a single mask pass ---------------------
    # The per-row mean 1/row_sum is a positive scalar per row and cancels
    # exactly in F.normalize(p=2, dim=1), so it is dropped (no second mask
    # read, no row-sum reduction, no ones column).
    vs = jnp.dot(mask_ref[...], eo_ref[...], preferred_element_type=f32)  # (tm, 2F)

    def norm_sigmoid(v):                       # F.normalize -> sigmoid (EUP)
        ss = jnp.sum(v * v, axis=1, keepdims=True)
        return jax.nn.sigmoid(v * lax.rsqrt(jnp.maximum(ss, 1e-24)))

    # Lane splits at f_out: free when F_out % 128 == 0 (production); tiny
    # masked lane ops at the demo width.
    g = norm_sigmoid(vs[:, :f_out])
    g_a = norm_sigmoid(vs[:, f_out:])

    # ---- discriminator: shared Wd, two small dots (no block-diag zeros) -----
    zb = zb_ref[...]
    emb = jnp.maximum(zb[:, :f_out], 0.0)
    emb_a = jnp.maximum(zb[:, f_out:], 0.0)
    t = jnp.dot(emb, wd_ref[...], preferred_element_type=f32)
    t_a = jnp.dot(emb_a, wd_ref[...], preferred_element_type=f32)

    bd = bd_ref[0, 0]                                   # SMEM scalar
    s_e_g = jnp.sum(t * g, axis=1, keepdims=True) + bd      # f_k(emb,   g)
    s_a_g = jnp.sum(t_a * g, axis=1, keepdims=True) + bd    # f_k(emb_a, g)
    s_a_ga = jnp.sum(t_a * g_a, axis=1, keepdims=True) + bd  # f_k(emb_a, g_a)
    s_e_ga = jnp.sum(t * g_a, axis=1, keepdims=True) + bd    # f_k(emb,   g_a)

    # one lane-dense store: [h | ret | ret_a]
    slab_ref[...] = jnp.concatenate([h, s_e_g, s_a_g, s_a_ga, s_e_ga], axis=1)


# ---------------------------------------------------------------------------
# Wrapper
# ---------------------------------------------------------------------------
def encoder2_forward(feat, feat_a, adj, graph_neigh, params, *,
                     block_rows=None, vmem_limit_bytes=None):
    N, F_in = feat.shape
    F_out = params["w1"].shape[1]
    f32, bf16 = jnp.float32, jnp.bfloat16

    if block_rows is None:
        block_rows = min(N, 256)
    tm = block_rows
    assert N % tm == 0 and (tm % 8 == 0 or tm == N)

    def cparams():
        kw = dict(dimension_semantics=("parallel",))
        if vmem_limit_bytes is not None:   # v5e: scoped-VMEM default is 16 MiB
            kw["vmem_limit_bytes"] = vmem_limit_bytes
        return pltpu.CompilerParams(**kw)

    # ---- call 1: projection (row-stacked streams, packed [w1 | wr]) --------
    x_stack = jnp.concatenate([feat, feat_a], axis=0)               # (2N, F_in)
    w_cat = jnp.concatenate([params["w1"], params["wr"]], axis=1)   # (F_in, 2F)
    b_cat = jnp.concatenate([jnp.zeros((1, F_out), f32), params["br"]], axis=1)

    proj = pl.pallas_call(
        project_kernel,
        out_shape=jax.ShapeDtypeStruct((2 * N, 2 * F_out), f32),
        grid=(2 * N // tm,),
        in_specs=[pl.BlockSpec((tm, F_in), lambda i: (i, 0)),
                  pl.BlockSpec((F_in, 2 * F_out), lambda i: (0, 0)),
                  pl.BlockSpec((1, 2 * F_out), lambda i: (0, 0))],
        out_specs=pl.BlockSpec((tm, 2 * F_out), lambda i: (i, 0)),
        compiler_params=cparams(),
    )(x_stack, w_cat, b_cat)

    # layout plumbing on skinny (N, 2F) tensors: lane-concat the two streams so
    # the N^2 matmuls run one wide (2F) MXU pass per adj row block; cast the
    # MXU RHS operands to bf16 (f32 accumulation stays in-kernel).
    pg = jnp.concatenate([proj[:N, :F_out], proj[N:, :F_out]], axis=1).astype(bf16)
    rz = jnp.concatenate([proj[:N, F_out:], proj[N:, F_out:]], axis=1)     # f32
    adj_bf = adj.astype(bf16)
    mask_bf = graph_neigh.astype(bf16)

    # ---- call 2: z / z_a = adj @ (feat*/w1) + residual  (row-parallel) ------
    zb = pl.pallas_call(
        gcn_kernel,
        out_shape=jax.ShapeDtypeStruct((N, 2 * F_out), f32),
        grid=(N // tm,),
        in_specs=[pl.BlockSpec((tm, N), lambda i: (i, 0)),            # adj rows (bf16)
                  pl.BlockSpec((N, 2 * F_out), lambda i: (0, 0)),     # pg (resident)
                  pl.BlockSpec((tm, 2 * F_out), lambda i: (i, 0))],   # residual rows
        out_specs=pl.BlockSpec((tm, 2 * F_out), lambda i: (i, 0)),
        compiler_params=cparams(),
    )(adj_bf, pg, rz)

    hiden_emb = zb[:, :F_out]                       # module output 1 (= z)
    z0_bf = hiden_emb.astype(bf16)                  # RHS of the (adj @ z) pass
    eo_bf = jnp.maximum(zb, 0.0).astype(bf16)       # [emb | emb_a] readout RHS
    # (relu/cast above is O(N*F) dtype plumbing; the discriminator recomputes
    #  emb in f32 from zb inside kernel 3.)

    # ---- call 3: h + readout + discriminator  (row-parallel) ----------------
    slab = pl.pallas_call(
        functools.partial(head_kernel, f_out=F_out),
        out_shape=jax.ShapeDtypeStruct((N, F_in + 4), f32),
        grid=(N // tm,),
        in_specs=[pl.BlockSpec((tm, N), lambda i: (i, 0)),            # adj rows
                  pl.BlockSpec((tm, N), lambda i: (i, 0)),            # mask rows
                  pl.BlockSpec((tm, 2 * F_out), lambda i: (i, 0)),    # z rows (f32)
                  pl.BlockSpec((N, F_out), lambda i: (0, 0)),         # z (bf16, resident)
                  pl.BlockSpec((N, 2 * F_out), lambda i: (0, 0)),     # emb both (bf16, resident)
                  pl.BlockSpec((F_out, F_in), lambda i: (0, 0)),      # w2
                  pl.BlockSpec((F_out, F_out), lambda i: (0, 0)),     # wd
                  pl.BlockSpec(memory_space=pltpu.MemorySpace.SMEM)], # bd scalar
        out_specs=pl.BlockSpec((tm, F_in + 4), lambda i: (i, 0)),
        compiler_params=cparams(),
    )(adj_bf, mask_bf, zb, z0_bf, eo_bf, params["w2"], params["wd"], params["bd"])

    h = slab[:, :F_in]
    ret = slab[:, F_in:F_in + 2]
    ret_a = slab[:, F_in + 2:F_in + 4]
    return hiden_emb, h, ret, ret_a


# ----------------------------- reference (plain JAX, full f32) --------------
def encoder2_reference(feat, feat_a, adj, mask, p):
    res = feat @ p["wr"] + p["br"]
    res_a = feat_a @ p["wr"] + p["br"]
    z = adj @ (feat @ p["w1"]) + res
    z_a = adj @ (feat_a @ p["w1"]) + res_a
    hid = z
    h = adj @ (z @ p["w2"])
    emb = jnp.maximum(z, 0.0)
    emb_a = jnp.maximum(z_a, 0.0)

    def readout(e):
        vsum = mask @ e
        ge = vsum / jnp.sum(mask, axis=1, keepdims=True)
        nrm = jnp.sqrt(jnp.sum(ge * ge, axis=1, keepdims=True))
        return jax.nn.sigmoid(ge / jnp.maximum(nrm, 1e-12))

    g, g_a = readout(emb), readout(emb_a)

    def bilin(x1, x2):
        return jnp.sum((x1 @ p["wd"]) * x2, axis=1, keepdims=True) + p["bd"]

    ret = jnp.concatenate([bilin(emb, g), bilin(emb_a, g)], axis=1)
    ret_a = jnp.concatenate([bilin(emb_a, g_a), bilin(emb, g_a)], axis=1)
    return hid, h, ret, ret_a


# ----------------------------- parameter init -------------------------------
def xavier_uniform(key, shape, fan_in, fan_out):
    bound = float(np.sqrt(6.0 / (fan_in + fan_out)))
    return jax.random.uniform(key, shape, jnp.float32, -bound, bound)


def make_params(key, f_in, f_out):
    k1, k2, k3, k4, k5 = jax.random.split(key, 5)
    w1 = xavier_uniform(k1, (f_in, f_out), f_in, f_out)       # Encoder.weight1
    w2 = xavier_uniform(k2, (f_out, f_in), f_out, f_in)       # Encoder.weight2
    # residual_fc: nn.Linear(f_in, f_out); stored pre-transposed as (f_in, f_out)
    wr = xavier_uniform(k3, (f_in, f_out), f_in, f_out)
    br = xavier_uniform(k4, (1, f_out), f_in, f_out)
    # Discriminator bilinear weight (1, f_out, f_out) -> (f_out, f_out); bias 0
    wd = xavier_uniform(k5, (f_out, f_out), f_out * f_out, f_out)
    bd = jnp.zeros((1, 1), jnp.float32)
    return {"w1": w1, "w2": w2, "wr": wr, "br": br, "wd": wd, "bd": bd}


if __name__ == "__main__":
    N, F_IN, F_OUT = 64, 32, 16

    key = jax.random.PRNGKey(0)
    k_feat, k_feata, k_adj, k_mask, k_par = jax.random.split(key, 5)

    feat = jax.random.normal(k_feat, (N, F_IN), jnp.float32)
    feat_a = jax.random.normal(k_feata, (N, F_IN), jnp.float32)
    adj = jax.random.uniform(k_adj, (N, N), jnp.float32) / N
    graph_neigh = (jax.random.uniform(k_mask, (N, N)) > 0.5).astype(jnp.float32)
    graph_neigh = jnp.maximum(graph_neigh, jnp.eye(N, dtype=jnp.float32))  # no zero rows

    params = make_params(k_par, F_IN, F_OUT)

    # block_rows=32 -> grids of (4,)/(2,)/(2,) to exercise the row-blocked path.
    outs = encoder2_forward(feat, feat_a, adj, graph_neigh, params, block_rows=32)
    outs = jax.block_until_ready(outs)

    refs = encoder2_reference(feat, feat_a, adj, graph_neigh, params)
    # Tolerance loosened (bf16 operands on the N^2 matmuls, f32 accumulation).
    for o, r in zip(outs, refs):
        np.testing.assert_allclose(np.asarray(o), np.asarray(r),
                                   rtol=2e-2, atol=2e-2)

    print("KERNEL_OK")
</pallas_src>

<mosaic_0001>
module attributes {stable_mosaic.version = 11 : i64} {
  func.func @project_kernel(%arg0: i32, %arg1: memref<32x32xf32, #tpu.memory_space<vmem>>, %arg2: memref<32x32xf32, #tpu.memory_space<vmem>>, %arg3: memref<1x32xf32, #tpu.memory_space<vmem>>, %arg4: memref<32x32xf32, #tpu.memory_space<vmem>>) attributes {dimension_semantics = [#tpu.dimension_semantics<parallel>], iteration_bounds = array<i64: 4>, scalar_prefetch = 0 : i64, scratch_operands = 0 : i64, tpu.core_type = #tpu.core_type<tc>, window_params = [{transform_indices = @transform_0, window_bounds = array<i64: 32, 32>}, {pipeline_mode = #tpu.pipeline_mode<synchronous>, transform_indices = @transform_1, window_bounds = array<i64: 32, 32>}, {pipeline_mode = #tpu.pipeline_mode<synchronous>, transform_indices = @transform_2, window_bounds = array<i64: 1, 32>}, {transform_indices = @transform_3, window_bounds = array<i64: 32, 32>}]} {
    %c0 = arith.constant 0 : index
    %c0_0 = arith.constant 0 : index
    %0 = vector.load %arg1[%c0, %c0_0] : memref<32x32xf32, #tpu.memory_space<vmem>>, vector<32x32xf32>
    %c0_1 = arith.constant 0 : index
    %c0_2 = arith.constant 0 : index
    %1 = vector.load %arg2[%c0_1, %c0_2] : memref<32x32xf32, #tpu.memory_space<vmem>>, vector<32x32xf32>
    %cst = arith.constant dense<0.000000e+00> : vector<32x32xf32>
    %2 = tpu.matmul %0, %1, %cst {dimension_numbers = #tpu.dot_dimension_numbers<[1], [0], [0], [1], [0, 0, 1, 1], [], []>} : vector<32x32xf32>, vector<32x32xf32>, vector<32x32xf32> -> vector<32x32xf32>
    %c0_3 = arith.constant 0 : index
    %c0_4 = arith.constant 0 : index
    %3 = vector.load %arg3[%c0_3, %c0_4] : memref<1x32xf32, #tpu.memory_space<vmem>>, vector<1x32xf32>
    %4 = vector.broadcast %3 : vector<1x32xf32> to vector<32x32xf32>
    %5 = arith.addf %2, %4 : vector<32x32xf32>
    %c0_5 = arith.constant 0 : index
    %c0_6 = arith.constant 0 : index
    %6 = vector.load %arg4[%c0_5, %c0_6] : memref<32x32xf32, #tpu.memory_space<vmem>>, vector<32x32xf32>
    tpu.vector_store %arg4[%c0_5, %c0_6], %5 {strides = array<i32>} : memref<32x32xf32, #tpu.memory_space<vmem>>, vector<32x32xf32>,
    return
  }
  func.func @transform_0(%arg0: i32) -> (i32, i32) {
    %c0_i32 = arith.constant 0 : i32
    %c0_i32_0 = arith.constant 0 : i32
    return %arg0, %c0_i32 : i32, i32
  }
  func.func @transform_1(%arg0: i32) -> (i32, i32) {
    %c0_i32 = arith.constant 0 : i32
    %c0_i32_0 = arith.constant 0 : i32
    %c0_i32_1 = arith.constant 0 : i32
    return %c0_i32, %c0_i32_0 : i32, i32
  }
  func.func @transform_2(%arg0: i32) -> (i32, i32) {
    %c0_i32 = arith.constant 0 : i32
    %c0_i32_0 = arith.constant 0 : i32
    %c0_i32_1 = arith.constant 0 : i32
    return %c0_i32, %c0_i32_0 : i32, i32
  }
  func.func @transform_3(%arg0: i32) -> (i32, i32) {
    %c0_i32 = arith.constant 0 : i32
    %c0_i32_0 = arith.constant 0 : i32
    return %arg0, %c0_i32 : i32, i32
  }
}

</mosaic_0001>

<bundles_post_ra>
// kernel: tpu_custom_call.1
= control target key start
LH: loop header
LB: loop body
LE: loop exit
PB: predicated region body
PF: predicated region fallthrough
CT: control target
= control target key end

     0   :  { %s433_s12 = smov 0   ;;  %s473_s0 = inlined_call_operand.vmem [shape: f32[128,32], index: 0, kind: input, shape index: {}]   ;;  %s474_s1 = inlined_call_operand.vmem [shape: f32[32,32], index: 1, kind: input, shape index: {}]   ;;  %s475_s2 = inlined_call_operand.vmem [shape: f32[1,32], index: 2, kind: input, shape index: {}]   ;;  %s476_s3 = inlined_call_operand.vmem [shape: f32[128,32], index: 3, kind: output, shape index: {}]  }
   0x1 LB: > { %s347_s13 = sadd.s32 4294967295, %s411_s12   ;;  %p351_p0 = scmp.ge.s32.totalorder %s411_s12, 1  ;;  %s411_s12 = sphi %s433_s12, %s13_s12  }
   0x2   : > { %p138_p1 = scmp.lt.s32.totalorder %s411_s12, 5 }
   0x4   : > { %p139_p2 = pnand %p351_p0, %p138_p1 }
   0x5   : > { %v178_v0 = vld [vmem:[%s474_s1] sm:$0xff] (!%p139_p2)  ;;  %v179_v1 = vld [vmem:[%s474_s1 + $0x8] sm:$0xff] (!%p139_p2)  ;;  %v180_v2 = vld [vmem:[%s474_s1 + $0x10] sm:$0xff] (!%p139_p2)  ;;  %s352_s20 = sshll.u32 (!%p139_p2), %s347_s13, 2  ;;  %vm189_vm0 = vcmask (!%p139_p2), 261120  }
   0x6   : > { %142 = sbr.rel (%p139_p2) target bundleno = 234 (0xea), region = 32  ;;  %v385_v3 = vpack.c.bf16 (!%p139_p2), %v179_v1, %v178_v0  ;;  %v181_v4 = vld [vmem:[%s474_s1 + $0x18] sm:$0xff] (!%p139_p2)  ;;  %p163_p3 = scmp.lt.s32.totalorder (!%p139_p2), %s352_s20, 15  ;;  %v356_v10 = vld [vmem:[%s475_s2] ss:$0 sm:$0xff] (!%p139_p2) }
   0x7   : > { %v389_v5 = vpack.c.bf16 (!%p139_p2), %v181_v4, %v180_v2 }
   0x8   : > { %386 = vmatprep.subr.bf16.mxu0 (!%p139_p2), %v385_v3  ;;  %393 = vmatprep.subr.bf16.mxu1 (!%p139_p2), %v385_v3 }
   0x9   : > { %388 = vmatpush3.bf16.msra.mxu0 (!%p139_p2), %v385_v3  ;;  %395 = vmatpush3.bf16.msra.mxu1 (!%p139_p2), %v385_v3 }
   0xa   : > { %390 = vmatprep.subr.bf16.mxu0 (!%p139_p2), %v389_v5  ;;  %394 = vmatprep.subr.bf16.mxu1 (!%p139_p2), %v389_v5 }
   0xd   : > { %s478_s20 = smov (!%p163_p3, %s352_s20), 15  ;;  %392 = vmatpush3.bf16.msra.mxu0 %v389_v5  ;;  %396 = vmatpush3.bf16.msra.mxu1 %v389_v5 }
   0xe   : > { %s353_s23 = sshll.u32 %s478_s20, 3 }
   0xf   : > { %s166_s26 = scalar_lea.vmem %s473_s0, %s353_s23  ;;  %s172_s4 = scalar_lea.vmem %s476_s3, %s353_s23 }
  0x10   : > { %v174_v6 = vld [vmem:[%s166_s26] sm:$0xff]  ;;  %v176_v7 = vld [vmem:[%s166_s26 + $0x10] sm:$0xff]  ;;  %v175_v8 = vld [vmem:[%s166_s26 + $0x8] sm:$0xff] }
  0x11   : > { %v177_v9 = vld [vmem:[%s166_s26 + $0x18] sm:$0xff]  ;;  %379 = vmatprep.mubr.msk.f32.mxu0 %vm189_vm0, %v174_v6  ;;  %382 = vmatprep.mubr.msk.f32.mxu1 %vm189_vm0, %v176_v7 }
  0x12   : > { %380 = vmatmul.mubr.msk.f32.vlgmr.msra.gmra.mrb[0].mxu0 %vm189_vm0, %v175_v8  ;;  %383 = vmatmul.mubr.msk.f32.vlgmr.msra.gmra.mrb[0].mxu1 %vm189_vm0, %v177_v9 }
  0xe5   : > { %v381_v11 = vpop.f32.mrb[0].mxu0  ;;  %v384_v12 = vpop.f32.mrb[0].mxu1 }
  0xe6   : > { %v274_v13 = vadd.f32 %v381_v11, %v356_v10  ;;  %v284_v14 = vadd.f32 %v384_v12, %v356_v10  ;;  %v268_v15 = vpop.f32.mrb[1].mxu0  ;;  %v278_v16 = vpop.f32.mrb[1].mxu1 }
  0xe7   : > { %v269_v17 = vadd.f32 %v356_v10, %v268_v15  ;;  %v279_v18 = vadd.f32 %v356_v10, %v278_v16 }
  0xe8   : > { %288 = vst.msk [vmem:[%s172_s4 + $0x8] sm:$0xff] %vm189_vm0, %v274_v13  ;;  %290 = vst.msk [vmem:[%s172_s4 + $0x18] sm:$0xff] %vm189_vm0, %v284_v14 }
  0xe9   : > { %287 = vst.msk [vmem:[%s172_s4] sm:$0xff] %vm189_vm0, %v269_v17  ;;  %289 = vst.msk [vmem:[%s172_s4 + $0x10] sm:$0xff] %vm189_vm0, %v279_v18 }
  0xea PF: > { %s13_s12 = sadd.s32 1, %s411_s12  }
  0xeb   : > { %p10_p4 = scmp.ge.s32.totalorder %s13_s12, 6  }
  0xed   :  { %12 = sbr.rel (!%p10_p4) target bundleno = 1 (0x1), region = 62 }

</bundles_post_ra>
